<compile_context>
chip_gen: v6e
topology: v6e:2x2x1
jax: 0.10.0
libtpu: 0.0.40
codegen_flags: <defaults>
</compile_context>

<pallas_src>
import functools

import jax
import jax.numpy as jnp
from jax.experimental import pallas as pl
from jax.experimental.pallas import tpu as pltpu


def _human_seg_kernel(W, x_ref, w_ref, b1_ref, w2_ref, col_ref, b2_ref, out_ref):
    # x_ref  : (Cin_p, TB)       bf16  halo'd, pixel-flattened activation tile
    #                                  (TB = T + 2W + 2, rows padded, width not)
    # w_ref  : (9, Cmid, Cin_p)  bf16  one (Cmid, Cin_p) matrix per 3x3 tap
    # b1_ref : (Cmid, 1)         f32
    # w2_ref : (Cmid, 1)         f32   1x1 conv weights (Cout == 1)
    # col_ref: (1, T)            i32   output-pixel column index (q % W)
    # b2_ref : (1,)              f32   scalar bias, SMEM
    # out_ref: (1, T)            f32   lane-dense output (pixels on lanes)
    T = out_ref.shape[-1]
    colq = col_ref[...]
    left = colq == 0            # output col 0  -> kx=0 taps read garbage -> mask
    right = colq == (W - 1)     # output col W-1 -> kx=2 taps read garbage -> mask
    zero = jnp.zeros((), dtype=x_ref.dtype)

    acc = None
    for ky in range(3):
        for kx in range(3):
            off = ky * W + kx                       # static lane offset
            v = x_ref[:, off:off + T]               # (Cin_p, T) bf16 tap view
            if kx == 0:
                v = jnp.where(left, zero, v)
            elif kx == 2:
                v = jnp.where(right, zero, v)
            d = jnp.dot(w_ref[3 * ky + kx], v,
                        preferred_element_type=jnp.float32)   # (Cmid, T) MXU
            acc = d if acc is None else acc + d

    hidden = jnp.maximum(acc + b1_ref[...], 0.0)              # f32 VPU
    # 1x1 conv, Cout=1: VPU multiply + sublane reduction (XLU); output stays
    # lane-dense, no near-empty MXU pass.
    y = jnp.sum(hidden * w2_ref[...], axis=0, keepdims=True) + b2_ref[0]
    out_ref[...] = y.astype(out_ref.dtype)


def _pick_pixel_tile(H, W, cin_p, max_tile=2048, max_block_bytes=4 * 1024 * 1024):
    """Pixel tile T = TR*W: row-aligned (halo is exactly one row on each side),
    multiple of 128 (lane-dense output store), double-buffered bf16 input block
    comfortably inside the scoped-VMEM default on v5e/v6e/v7x, and preferring
    >=2 pixel tiles so both v7x TensorCores have work."""
    P = H * W
    candidates = []
    for tr in range(1, H + 1):
        if H % tr:
            continue
        t = tr * W
        if t > max_tile or t % 128:
            continue
        if 2 * cin_p * (t + 2 * W + 2) * 2 > max_block_bytes:
            continue
        candidates.append(t)
    if not candidates:
        # TODO(synk): for large images with awkward W, pad P up to a multiple
        #             of 128 instead of this single full-size block fallback.
        return P
    multi = [t for t in candidates if P // t >= 2]
    return max(multi) if multi else max(candidates)


def human_seg_forward(im, res, features, params):
    """im/res/features: NCHW float32.  Returns y: (B, 1, H, W)."""
    w1, b1, w2, b2 = params
    B, _, H, W = im.shape
    Cin = im.shape[1] + res.shape[1] + features.shape[1]
    # Checkpoint weights must be HWIO so the per-tap (ky, kx) split below is
    # correct; fail loudly otherwise (review correctness concern).
    assert w1.shape[:3] == (3, 3, Cin), "w1 must be HWIO (3, 3, Cin, Cmid)"
    Cmid = w1.shape[-1]
    Cout = w2.shape[-1]
    assert Cout == 1, "human-seg head produces a single channel"
    P = H * W

    Cin_p = ((Cin + 15) // 16) * 16            # bf16 sublane packing
    T = _pick_pixel_tile(H, W, Cin_p)          # pixel tile (multiple of W)
    NT = P // T
    TB = T + 2 * W + 2                         # halo'd lane span per tile

    # ---- activations: concat -> bf16 (cast EARLY, before any inflation)
    #      -> pad channels + one zero row top/bottom -> flatten pixels
    #      -> per-tile halo'd slabs (~(TB/T)x HBM instead of 9x im2col).
    x = jnp.concatenate([im, res, features], axis=1).astype(jnp.bfloat16)
    x = jnp.pad(x, ((0, 0), (0, Cin_p - Cin), (1, 1), (0, 0)))   # (B,Cin_p,H+2,W)
    xf = x.reshape(B, Cin_p, (H + 2) * W)
    # prepend 1 zero (kx=0 tap of the very first pixel) and append 1 zero so the
    # last tile's halo'd slice stays in range:  L = (NT-1)*T + TB = (H+2)*W + 2.
    xf = jnp.pad(xf, ((0, 0), (0, 0), (1, 1)))                    # (B,Cin_p,L)
    x_tiles = jnp.stack([xf[:, :, t * T: t * T + TB] for t in range(NT)],
                        axis=1)                                   # (B,NT,Cin_p,TB)

    # ---- weights: HWIO (3,3,Cin,Cmid) -> 9 resident (Cmid, Cin_p) bf16 taps.
    w_taps = jnp.transpose(w1, (0, 1, 3, 2)).reshape(9, Cmid, Cin)
    w_taps = jnp.pad(w_taps, ((0, 0), (0, 0), (0, Cin_p - Cin))).astype(jnp.bfloat16)
    b1c = b1.reshape(Cmid, 1).astype(jnp.float32)
    w2c = w2.reshape(Cmid, 1).astype(jnp.float32)
    b2c = b2.reshape(1).astype(jnp.float32)                       # -> SMEM scalar
    colq = (jnp.arange(T, dtype=jnp.int32) % W).reshape(1, T)     # edge-mask pattern

    kernel = functools.partial(_human_seg_kernel, W)

    out = pl.pallas_call(
        kernel,
        out_shape=jax.ShapeDtypeStruct((B, 1, P), jnp.float32),
        grid_spec=pltpu.PrefetchScalarGridSpec(
            num_scalar_prefetch=0,
            grid=(B, NT),
            in_specs=[
                pl.BlockSpec((None, None, Cin_p, TB), lambda b, t: (b, t, 0, 0)),
                pl.BlockSpec((9, Cmid, Cin_p), lambda b, t: (0, 0, 0)),
                pl.BlockSpec((Cmid, 1), lambda b, t: (0, 0)),
                pl.BlockSpec((Cmid, 1), lambda b, t: (0, 0)),
                pl.BlockSpec((1, T), lambda b, t: (0, 0)),
                pl.BlockSpec(memory_space=pltpu.MemorySpace.SMEM),
            ],
            out_specs=pl.BlockSpec((None, 1, T), lambda b, t: (b, 0, t)),
        ),
        compiler_params=pltpu.CompilerParams(
            dimension_semantics=("parallel", "parallel")),
    )(x_tiles, w_taps, b1c, w2c, colq, b2c)

    # (B, 1, H*W) -> (B, 1, H, W): free reshape (no transpose) since Cout == 1
    return out.reshape(B, 1, H, W)


def _reference_forward(im, res, features, params):
    """Plain-JAX reference (lax.conv) with matching bf16 quantization."""
    w1, b1, w2, b2 = params
    bf = lambda a: a.astype(jnp.bfloat16).astype(jnp.float32)
    x = bf(jnp.concatenate([im, res, features], axis=1))          # NCHW
    k1 = jnp.transpose(bf(w1), (3, 2, 0, 1))                      # HWIO -> OIHW
    y = jax.lax.conv_general_dilated(
        x, k1, window_strides=(1, 1), padding="SAME",
        dimension_numbers=("NCHW", "OIHW", "NCHW"),
        precision=jax.lax.Precision.HIGHEST)
    y = jnp.maximum(y + b1.reshape(1, -1, 1, 1), 0.0)
    z = jnp.sum(y * w2.reshape(1, -1, 1, 1), axis=1, keepdims=True)
    return z + b2.reshape(1, -1, 1, 1)


if __name__ == "__main__":
    key = jax.random.PRNGKey(0)
    kim, kres, kfeat, kw1, kw2 = jax.random.split(key, 5)

    B, H, W = 2, 16, 16
    C_im, C_res, C_feat = 3, 4, 8
    Cin = C_im + C_res + C_feat   # 15
    Cmid, Cout = 32, 1

    im = jax.random.normal(kim, (B, C_im, H, W), dtype=jnp.float32)
    res = jax.random.normal(kres, (B, C_res, H, W), dtype=jnp.float32)
    features = jax.random.normal(kfeat, (B, C_feat, H, W), dtype=jnp.float32)

    # deterministic synthetic parameters (HWIO / IO layouts)
    w1 = 0.05 * jax.random.normal(kw1, (3, 3, Cin, Cmid), dtype=jnp.float32)
    b1 = 0.01 * jnp.arange(Cmid, dtype=jnp.float32).reshape(1, Cmid)
    w2 = 0.05 * jax.random.normal(kw2, (Cmid, Cout), dtype=jnp.float32)
    b2 = jnp.full((1, Cout), 0.1, dtype=jnp.float32)
    params = (w1, b1, w2, b2)

    y = human_seg_forward(im, res, features, params)
    y = jax.block_until_ready(y)

    y_ref = _reference_forward(im, res, features, params)
    assert y.shape == (B, Cout, H, W)
    assert jnp.allclose(y, y_ref, rtol=1e-3, atol=1e-3), "mismatch vs reference"

    print("KERNEL_OK")
</pallas_src>

<mosaic_0001>
module attributes {stable_mosaic.version = 11 : i64} {
  func.func @_human_seg_kernel(%arg0: i32, %arg1: i32, %arg2: memref<1x1x16x162xbf16, #tpu.memory_space<vmem>>, %arg3: memref<9x32x16xbf16, #tpu.memory_space<vmem>>, %arg4: memref<32x1xf32, #tpu.memory_space<vmem>>, %arg5: memref<32x1xf32, #tpu.memory_space<vmem>>, %arg6: memref<1x128xi32, #tpu.memory_space<vmem>>, %arg7: memref<1xf32, #tpu.memory_space<smem>>, %arg8: memref<1x1x128xf32, #tpu.memory_space<vmem>>) attributes {dimension_semantics = [#tpu.dimension_semantics<parallel>, #tpu.dimension_semantics<parallel>], iteration_bounds = array<i64: 2, 2>, scalar_prefetch = 0 : i64, scratch_operands = 0 : i64, tpu.core_type = #tpu.core_type<tc>, window_params = [{transform_indices = @transform_0, window_bounds = array<i64: 1, 1, 16, 162>}, {pipeline_mode = #tpu.pipeline_mode<synchronous>, transform_indices = @transform_1, window_bounds = array<i64: 9, 32, 16>}, {pipeline_mode = #tpu.pipeline_mode<synchronous>, transform_indices = @transform_2, window_bounds = array<i64: 32, 1>}, {pipeline_mode = #tpu.pipeline_mode<synchronous>, transform_indices = @transform_3, window_bounds = array<i64: 32, 1>}, {pipeline_mode = #tpu.pipeline_mode<synchronous>, transform_indices = @transform_4, window_bounds = array<i64: 1, 128>}, {transform_indices = @transform_5, window_bounds = array<i64: 1>}, {transform_indices = @transform_6, window_bounds = array<i64: 1, 1, 128>}]} {
    %c0 = arith.constant 0 : index
    %c0_0 = arith.constant 0 : index
    %0 = vector.load %arg6[%c0, %c0_0] : memref<1x128xi32, #tpu.memory_space<vmem>>, vector<1x128xi32>
    %c0_i32 = arith.constant 0 : i32
    %1 = vector.broadcast %c0_i32 : i32 to vector<1x128xi32>
    %2 = arith.cmpi eq, %0, %1 : vector<1x128xi32>
    %c15_i32 = arith.constant 15 : i32
    %3 = vector.broadcast %c15_i32 : i32 to vector<1x128xi32>
    %4 = arith.cmpi eq, %0, %3 : vector<1x128xi32>
    %c0_1 = arith.constant 0 : index
    %c0_2 = arith.constant 0 : index
    %c0_3 = arith.constant 0 : index
    %c0_4 = arith.constant 0 : index
    %5 = vector.load %arg2[%c0_1, %c0_2, %c0_3, %c0_4] : memref<1x1x16x162xbf16, #tpu.memory_space<vmem>>, vector<1x1x16x128xbf16>
    %6 = vector.shape_cast %5 : vector<1x1x16x128xbf16> to vector<16x128xbf16>
    %cst = arith.constant 0.000000e+00 : bf16
    %7 = vector.shape_cast %2 : vector<1x128xi1> to vector<1x128xi1>
    %8 = vector.broadcast %7 : vector<1x128xi1> to vector<16x128xi1>
    %9 = vector.broadcast %cst : bf16 to vector<16x128xbf16>
    %10 = arith.select %8, %9, %6 : vector<16x128xi1>, vector<16x128xbf16>
    %c0_5 = arith.constant 0 : index
    %c0_6 = arith.constant 0 : index
    %c0_7 = arith.constant 0 : index
    %11 = vector.load %arg3[%c0_5, %c0_6, %c0_7] : memref<9x32x16xbf16, #tpu.memory_space<vmem>>, vector<1x32x16xbf16>
    %12 = vector.shape_cast %11 : vector<1x32x16xbf16> to vector<32x16xbf16>
    %cst_8 = arith.constant dense<0.000000e+00> : vector<32x128xf32>
    %13 = tpu.matmul %12, %10, %cst_8 {dimension_numbers = #tpu.dot_dimension_numbers<[1], [0], [0], [1], [0, 0, 1, 1], [], []>} : vector<32x16xbf16>, vector<16x128xbf16>, vector<32x128xf32> -> vector<32x128xf32>
    %c0_9 = arith.constant 0 : index
    %c0_10 = arith.constant 0 : index
    %c0_11 = arith.constant 0 : index
    %c1 = arith.constant 1 : index
    %14 = vector.load %arg2[%c0_9, %c0_10, %c0_11, %c1] : memref<1x1x16x162xbf16, #tpu.memory_space<vmem>>, vector<1x1x16x128xbf16>
    %15 = vector.shape_cast %14 : vector<1x1x16x128xbf16> to vector<16x128xbf16>
    %c1_12 = arith.constant 1 : index
    %c0_13 = arith.constant 0 : index
    %c0_14 = arith.constant 0 : index
    %16 = vector.load %arg3[%c1_12, %c0_13, %c0_14] : memref<9x32x16xbf16, #tpu.memory_space<vmem>>, vector<1x32x16xbf16>
    %17 = vector.shape_cast %16 : vector<1x32x16xbf16> to vector<32x16xbf16>
    %cst_15 = arith.constant dense<0.000000e+00> : vector<32x128xf32>
    %18 = tpu.matmul %17, %15, %cst_15 {dimension_numbers = #tpu.dot_dimension_numbers<[1], [0], [0], [1], [0, 0, 1, 1], [], []>} : vector<32x16xbf16>, vector<16x128xbf16>, vector<32x128xf32> -> vector<32x128xf32>
    %19 = arith.addf %13, %18 : vector<32x128xf32>
    %c0_16 = arith.constant 0 : index
    %c0_17 = arith.constant 0 : index
    %c0_18 = arith.constant 0 : index
    %c2 = arith.constant 2 : index
    %20 = vector.load %arg2[%c0_16, %c0_17, %c0_18, %c2] : memref<1x1x16x162xbf16, #tpu.memory_space<vmem>>, vector<1x1x16x128xbf16>
    %21 = vector.shape_cast %20 : vector<1x1x16x128xbf16> to vector<16x128xbf16>
    %cst_19 = arith.constant 0.000000e+00 : bf16
    %22 = vector.shape_cast %4 : vector<1x128xi1> to vector<1x128xi1>
    %23 = vector.broadcast %22 : vector<1x128xi1> to vector<16x128xi1>
    %24 = vector.broadcast %cst_19 : bf16 to vector<16x128xbf16>
    %25 = arith.select %23, %24, %21 : vector<16x128xi1>, vector<16x128xbf16>
    %c2_20 = arith.constant 2 : index
    %c0_21 = arith.constant 0 : index
    %c0_22 = arith.constant 0 : index
    %26 = vector.load %arg3[%c2_20, %c0_21, %c0_22] : memref<9x32x16xbf16, #tpu.memory_space<vmem>>, vector<1x32x16xbf16>
    %27 = vector.shape_cast %26 : vector<1x32x16xbf16> to vector<32x16xbf16>
    %cst_23 = arith.constant dense<0.000000e+00> : vector<32x128xf32>
    %28 = tpu.matmul %27, %25, %cst_23 {dimension_numbers = #tpu.dot_dimension_numbers<[1], [0], [0], [1], [0, 0, 1, 1], [], []>} : vector<32x16xbf16>, vector<16x128xbf16>, vector<32x128xf32> -> vector<32x128xf32>
    %29 = arith.addf %19, %28 : vector<32x128xf32>
    %c0_24 = arith.constant 0 : index
    %c0_25 = arith.constant 0 : index
    %c0_26 = arith.constant 0 : index
    %c16 = arith.constant 16 : index
    %30 = vector.load %arg2[%c0_24, %c0_25, %c0_26, %c16] : memref<1x1x16x162xbf16, #tpu.memory_space<vmem>>, vector<1x1x16x128xbf16>
    %31 = vector.shape_cast %30 : vector<1x1x16x128xbf16> to vector<16x128xbf16>
    %cst_27 = arith.constant 0.000000e+00 : bf16
    %32 = vector.shape_cast %2 : vector<1x128xi1> to vector<1x128xi1>
    %33 = vector.broadcast %32 : vector<1x128xi1> to vector<16x128xi1>
    %34 = vector.broadcast %cst_27 : bf16 to vector<16x128xbf16>
    %35 = arith.select %33, %34, %31 : vector<16x128xi1>, vector<16x128xbf16>
    %c3 = arith.constant 3 : index
    %c0_28 = arith.constant 0 : index
    %c0_29 = arith.constant 0 : index
    %36 = vector.load %arg3[%c3, %c0_28, %c0_29] : memref<9x32x16xbf16, #tpu.memory_space<vmem>>, vector<1x32x16xbf16>
    %37 = vector.shape_cast %36 : vector<1x32x16xbf16> to vector<32x16xbf16>
    %cst_30 = arith.constant dense<0.000000e+00> : vector<32x128xf32>
    %38 = tpu.matmul %37, %35, %cst_30 {dimension_numbers = #tpu.dot_dimension_numbers<[1], [0], [0], [1], [0, 0, 1, 1], [], []>} : vector<32x16xbf16>, vector<16x128xbf16>, vector<32x128xf32> -> vector<32x128xf32>
    %39 = arith.addf %29, %38 : vector<32x128xf32>
    %c0_31 = arith.constant 0 : index
    %c0_32 = arith.constant 0 : index
    %c0_33 = arith.constant 0 : index
    %c17 = arith.constant 17 : index
    %40 = vector.load %arg2[%c0_31, %c0_32, %c0_33, %c17] : memref<1x1x16x162xbf16, #tpu.memory_space<vmem>>, vector<1x1x16x128xbf16>
    %41 = vector.shape_cast %40 : vector<1x1x16x128xbf16> to vector<16x128xbf16>
    %c4 = arith.constant 4 : index
    %c0_34 = arith.constant 0 : index
    %c0_35 = arith.constant 0 : index
    %42 = vector.load %arg3[%c4, %c0_34, %c0_35] : memref<9x32x16xbf16, #tpu.memory_space<vmem>>, vector<1x32x16xbf16>
    %43 = vector.shape_cast %42 : vector<1x32x16xbf16> to vector<32x16xbf16>
    %cst_36 = arith.constant dense<0.000000e+00> : vector<32x128xf32>
    %44 = tpu.matmul %43, %41, %cst_36 {dimension_numbers = #tpu.dot_dimension_numbers<[1], [0], [0], [1], [0, 0, 1, 1], [], []>} : vector<32x16xbf16>, vector<16x128xbf16>, vector<32x128xf32> -> vector<32x128xf32>
    %45 = arith.addf %39, %44 : vector<32x128xf32>
    %c0_37 = arith.constant 0 : index
    %c0_38 = arith.constant 0 : index
    %c0_39 = arith.constant 0 : index
    %c18 = arith.constant 18 : index
    %46 = vector.load %arg2[%c0_37, %c0_38, %c0_39, %c18] : memref<1x1x16x162xbf16, #tpu.memory_space<vmem>>, vector<1x1x16x128xbf16>
    %47 = vector.shape_cast %46 : vector<1x1x16x128xbf16> to vector<16x128xbf16>
    %cst_40 = arith.constant 0.000000e+00 : bf16
    %48 = vector.shape_cast %4 : vector<1x128xi1> to vector<1x128xi1>
    %49 = vector.broadcast %48 : vector<1x128xi1> to vector<16x128xi1>
    %50 = vector.broadcast %cst_40 : bf16 to vector<16x128xbf16>
    %51 = arith.select %49, %50, %47 : vector<16x128xi1>, vector<16x128xbf16>
    %c5 = arith.constant 5 : index
    %c0_41 = arith.constant 0 : index
    %c0_42 = arith.constant 0 : index
    %52 = vector.load %arg3[%c5, %c0_41, %c0_42] : memref<9x32x16xbf16, #tpu.memory_space<vmem>>, vector<1x32x16xbf16>
    %53 = vector.shape_cast %52 : vector<1x32x16xbf16> to vector<32x16xbf16>
    %cst_43 = arith.constant dense<0.000000e+00> : vector<32x128xf32>
    %54 = tpu.matmul %53, %51, %cst_43 {dimension_numbers = #tpu.dot_dimension_numbers<[1], [0], [0], [1], [0, 0, 1, 1], [], []>} : vector<32x16xbf16>, vector<16x128xbf16>, vector<32x128xf32> -> vector<32x128xf32>
    %55 = arith.addf %45, %54 : vector<32x128xf32>
    %c0_44 = arith.constant 0 : index
    %c0_45 = arith.constant 0 : index
    %c0_46 = arith.constant 0 : index
    %c32 = arith.constant 32 : index
    %56 = vector.load %arg2[%c0_44, %c0_45, %c0_46, %c32] : memref<1x1x16x162xbf16, #tpu.memory_space<vmem>>, vector<1x1x16x128xbf16>
    %57 = vector.shape_cast %56 : vector<1x1x16x128xbf16> to vector<16x128xbf16>
    %cst_47 = arith.constant 0.000000e+00 : bf16
    %58 = vector.shape_cast %2 : vector<1x128xi1> to vector<1x128xi1>
    %59 = vector.broadcast %58 : vector<1x128xi1> to vector<16x128xi1>
    %60 = vector.broadcast %cst_47 : bf16 to vector<16x128xbf16>
    %61 = arith.select %59, %60, %57 : vector<16x128xi1>, vector<16x128xbf16>
    %c6 = arith.constant 6 : index
    %c0_48 = arith.constant 0 : index
    %c0_49 = arith.constant 0 : index
    %62 = vector.load %arg3[%c6, %c0_48, %c0_49] : memref<9x32x16xbf16, #tpu.memory_space<vmem>>, vector<1x32x16xbf16>
    %63 = vector.shape_cast %62 : vector<1x32x16xbf16> to vector<32x16xbf16>
    %cst_50 = arith.constant dense<0.000000e+00> : vector<32x128xf32>
    %64 = tpu.matmul %63, %61, %cst_50 {dimension_numbers = #tpu.dot_dimension_numbers<[1], [0], [0], [1], [0, 0, 1, 1], [], []>} : vector<32x16xbf16>, vector<16x128xbf16>, vector<32x128xf32> -> vector<32x128xf32>
    %65 = arith.addf %55, %64 : vector<32x128xf32>
    %c0_51 = arith.constant 0 : index
    %c0_52 = arith.constant 0 : index
    %c0_53 = arith.constant 0 : index
    %c33 = arith.constant 33 : index
    %66 = vector.load %arg2[%c0_51, %c0_52, %c0_53, %c33] : memref<1x1x16x162xbf16, #tpu.memory_space<vmem>>, vector<1x1x16x128xbf16>
    %67 = vector.shape_cast %66 : vector<1x1x16x128xbf16> to vector<16x128xbf16>
    %c7 = arith.constant 7 : index
    %c0_54 = arith.constant 0 : index
    %c0_55 = arith.constant 0 : index
    %68 = vector.load %arg3[%c7, %c0_54, %c0_55] : memref<9x32x16xbf16, #tpu.memory_space<vmem>>, vector<1x32x16xbf16>
    %69 = vector.shape_cast %68 : vector<1x32x16xbf16> to vector<32x16xbf16>
    %cst_56 = arith.constant dense<0.000000e+00> : vector<32x128xf32>
    %70 = tpu.matmul %69, %67, %cst_56 {dimension_numbers = #tpu.dot_dimension_numbers<[1], [0], [0], [1], [0, 0, 1, 1], [], []>} : vector<32x16xbf16>, vector<16x128xbf16>, vector<32x128xf32> -> vector<32x128xf32>
    %71 = arith.addf %65, %70 : vector<32x128xf32>
    %c0_57 = arith.constant 0 : index
    %c0_58 = arith.constant 0 : index
    %c0_59 = arith.constant 0 : index
    %c34 = arith.constant 34 : index
    %72 = vector.load %arg2[%c0_57, %c0_58, %c0_59, %c34] : memref<1x1x16x162xbf16, #tpu.memory_space<vmem>>, vector<1x1x16x128xbf16>
    %73 = vector.shape_cast %72 : vector<1x1x16x128xbf16> to vector<16x128xbf16>
    %cst_60 = arith.constant 0.000000e+00 : bf16
    %74 = vector.shape_cast %4 : vector<1x128xi1> to vector<1x128xi1>
    %75 = vector.broadcast %74 : vector<1x128xi1> to vector<16x128xi1>
    %76 = vector.broadcast %cst_60 : bf16 to vector<16x128xbf16>
    %77 = arith.select %75, %76, %73 : vector<16x128xi1>, vector<16x128xbf16>
    %c8 = arith.constant 8 : index
    %c0_61 = arith.constant 0 : index
    %c0_62 = arith.constant 0 : index
    %78 = vector.load %arg3[%c8, %c0_61, %c0_62] : memref<9x32x16xbf16, #tpu.memory_space<vmem>>, vector<1x32x16xbf16>
    %79 = vector.shape_cast %78 : vector<1x32x16xbf16> to vector<32x16xbf16>
    %cst_63 = arith.constant dense<0.000000e+00> : vector<32x128xf32>
    %80 = tpu.matmul %79, %77, %cst_63 {dimension_numbers = #tpu.dot_dimension_numbers<[1], [0], [0], [1], [0, 0, 1, 1], [], []>} : vector<32x16xbf16>, vector<16x128xbf16>, vector<32x128xf32> -> vector<32x128xf32>
    %81 = arith.addf %71, %80 : vector<32x128xf32>
    %c0_64 = arith.constant 0 : index
    %c0_65 = arith.constant 0 : index
    %82 = vector.load %arg4[%c0_64, %c0_65] : memref<32x1xf32, #tpu.memory_space<vmem>>, vector<32x1xf32>
    %83 = vector.broadcast %82 : vector<32x1xf32> to vector<32x128xf32>
    %84 = arith.addf %81, %83 : vector<32x128xf32>
    %cst_66 = arith.constant 0.000000e+00 : f32
    %85 = vector.broadcast %cst_66 : f32 to vector<32x128xf32>
    %86 = arith.maximumf %84, %85 : vector<32x128xf32>
    %c0_67 = arith.constant 0 : index
    %c0_68 = arith.constant 0 : index
    %87 = vector.load %arg5[%c0_67, %c0_68] : memref<32x1xf32, #tpu.memory_space<vmem>>, vector<32x1xf32>
    %88 = vector.broadcast %87 : vector<32x1xf32> to vector<32x128xf32>
    %89 = arith.mulf %86, %88 : vector<32x128xf32>
    %cst_69 = arith.constant dense<0.000000e+00> : vector<128xf32>
    %90 = vector.multi_reduction <add>, %89, %cst_69 [0] : vector<32x128xf32> to vector<128xf32>
    %91 = vector.shape_cast %90 : vector<128xf32> to vector<1x128xf32>
    %c0_70 = arith.constant 0 : index
    %92 = memref.load %arg7[%c0_70] : memref<1xf32, #tpu.memory_space<smem>>
    %93 = vector.broadcast %92 : f32 to vector<1x128xf32>
    %94 = arith.addf %91, %93 : vector<1x128xf32>
    %c0_71 = arith.constant 0 : index
    %c0_72 = arith.constant 0 : index
    %c0_73 = arith.constant 0 : index
    %95 = vector.load %arg8[%c0_71, %c0_72, %c0_73] : memref<1x1x128xf32, #tpu.memory_space<vmem>>, vector<1x1x128xf32>
    %96 = vector.shape_cast %95 : vector<1x1x128xf32> to vector<1x128xf32>
    %97 = vector.shape_cast %94 : vector<1x128xf32> to vector<1x1x128xf32>
    tpu.vector_store %arg8[%c0_71, %c0_72, %c0_73], %97 {strides = array<i32>} : memref<1x1x128xf32, #tpu.memory_space<vmem>>, vector<1x1x128xf32>,
    return
  }
  func.func @transform_0(%arg0: i32, %arg1: i32) -> (i32, i32, i32, i32) {
    %c0_i32 = arith.constant 0 : i32
    %c0_i32_0 = arith.constant 0 : i32
    %c0_i32_1 = arith.constant 0 : i32
    return %arg0, %arg1, %c0_i32, %c0_i32_0 : i32, i32, i32, i32
  }
  func.func @transform_1(%arg0: i32, %arg1: i32) -> (i32, i32, i32) {
    %c0_i32 = arith.constant 0 : i32
    %c0_i32_0 = arith.constant 0 : i32
    %c0_i32_1 = arith.constant 0 : i32
    %c0_i32_2 = arith.constant 0 : i32
    return %c0_i32, %c0_i32_0, %c0_i32_1 : i32, i32, i32
  }
  func.func @transform_2(%arg0: i32, %arg1: i32) -> (i32, i32) {
    %c0_i32 = arith.constant 0 : i32
    %c0_i32_0 = arith.constant 0 : i32
    %c0_i32_1 = arith.constant 0 : i32
    return %c0_i32, %c0_i32_0 : i32, i32
  }
  func.func @transform_3(%arg0: i32, %arg1: i32) -> (i32, i32) {
    %c0_i32 = arith.constant 0 : i32
    %c0_i32_0 = arith.constant 0 : i32
    %c0_i32_1 = arith.constant 0 : i32
    return %c0_i32, %c0_i32_0 : i32, i32
  }
  func.func @transform_4(%arg0: i32, %arg1: i32) -> (i32, i32) {
    %c0_i32 = arith.constant 0 : i32
    %c0_i32_0 = arith.constant 0 : i32
    %c0_i32_1 = arith.constant 0 : i32
    return %c0_i32, %c0_i32_0 : i32, i32
  }
  func.func @transform_5(%arg0: i32, %arg1: i32) -> i32 {
    %c0_i32 = arith.constant 0 : i32
    %c0_i32_0 = arith.constant 0 : i32
    return %c0_i32 : i32
  }
  func.func @transform_6(%arg0: i32, %arg1: i32) -> (i32, i32, i32) {
    %c0_i32 = arith.constant 0 : i32
    %c0_i32_0 = arith.constant 0 : i32
    return %arg0, %c0_i32, %arg1 : i32, i32, i32
  }
}

</mosaic_0001>

<bundles_post_ra>
// kernel: tpu_custom_call.1
= control target key start
LH: loop header
LB: loop body
LE: loop exit
PB: predicated region body
PF: predicated region fallthrough
CT: control target
= control target key end

     0   :  { %s1969_s0 = inlined_call_operand.vmem [shape: bf16[2,2,16,162], index: 0, kind: input, shape index: {}]   ;;  %s1970_s1 = inlined_call_operand.vmem [shape: bf16[9,32,16], index: 1, kind: input, shape index: {}]   ;;  %s1971_s2 = inlined_call_operand.vmem [shape: f32[32,1], index: 2, kind: input, shape index: {}]   ;;  %s1972_s3 = inlined_call_operand.vmem [shape: f32[32,1], index: 3, kind: input, shape index: {}]   ;;  %s1973_s4 = inlined_call_operand.vmem [shape: s32[1,128], index: 4, kind: input, shape index: {}]   ;;  %s1974_s5 = inlined_call_operand.<no memory space> [shape: f32[1], index: 5, kind: input, shape index: {}]   ;;  %s1975_s6 = inlined_call_operand.hbm [shape: f32[2,1,256], index: 6, kind: output, shape index: {}]  }
   0x1   :  { %11 = sst [smem:[#allocation2]] %s1974_s5 }
   0x2   :  { %12 = vsyncpa [#allocation4], 0 }
   0x3   :  { %14 = vsyncpa [#allocation4 + $0x1], 0  ;;  %s1707_s23 = smov 0   ;;  %s1709_s24 = smov 0  }
   0x4   :  { %s1711_s25 = smov 0   ;;  %s1713_s26 = smov 0  }
   0x5   :  { %s1715_s27 = smov 0   ;;  %s1717_s28 = smov 0  }
   0x6   :  { %s1719_s29 = smov 0   ;;  %s1721_s30 = smov 0  }
   0x7 LB: > { %s1279_s5 = sadd.s32 4294967295, %s1652_s30   ;;  %s1280_s7 = sadd.s32 4294967294, %s1652_s30   ;;  %s1652_s30 = sphi %s1721_s30, %s20_s30   ;;  %s1648_s29 = sphi %s1719_s29, %s1986_s29   ;;  %s1644_s28 = sphi %s1717_s28, %s1985_s28   ;;  %s1640_s27 = sphi %s1715_s27, %s1984_s27   ;;  %s1636_s26 = sphi %s1713_s26, %s1983_s26   ;;  %s1632_s25 = sphi %s1711_s25, %s1982_s25   ;;  %s1628_s24 = sphi %s1709_s24, %s1981_s24   ;;  %s1624_s23 = sphi %s1707_s23, %s1980_s23  }
   0x8   : > { %s29_s8 = sadd.s32 1, %s1644_s28  ;;  %s32_s9 = sadd.s32 1, %s1648_s29 }
   0x9   : > { %p30_p0 = scmp.ge.s32.totalorder %s29_s8, 2  ;;  %p184_p1 = scmp.ne.s32.totalorder %s1632_s25, %s1628_s24 }
   0xa   : > { %p185_p2 = scmp.eq.s32.totalorder %s1279_s5, 3  ;;  %p190_p5 = scmp.ne.s32.totalorder %s1628_s24, %s1624_s23 }
   0xb   : > { %s1988_s8 = smov (%p30_p0, %s29_s8), 0  ;;  %s1990_s9 = smov (!%p30_p0, %s32_s9), %s1648_s29 }
   0xc   : > { %s170_s10 = ssub.s32 %s1644_s28, %s1988_s8  ;;  %p1758_p3 = por %p185_p2, %p184_p1 }
   0xd   : > { %p34_p4 = scmp.ge.s32.totalorder %s1990_s9, 2  ;;  %p191_p6 = scmp.eq.s32.totalorder %s1280_s7, 3 }
   0xe   : > { %p1283_p7 = scmp.ge.s32.totalorder %s1652_s30, 1  ;;  %p236_p9 = scmp.lt.s32.totalorder %s1652_s30, 5 }
   0xf   : > { %s1992_s9 = smov (%p34_p4, %s1990_s9), 0  ;;  %p1767_p8 = por %p191_p6, %p190_p5 }
  0x10   : > { %s169_s13 = ssub.s32 %s1648_s29, %s1992_s9  ;;  %s174_s14 = sadd.s32 1, %s1632_s25 }
  0x11   : > { %s171_s15 = sor.u32 %s170_s10, %s169_s13  ;;  %p237_p10 = pnand %p1283_p7, %p236_p9 }
  0x12   : > { %p172_p11 = scmp.eq.s32.totalorder %s171_s15, 0  ;;  %p269_p12 = scmp.lt.s32.totalorder (!%p237_p10), %s1640_s27, 1 }
  0x13   : > { %240 = sbr.rel (%p237_p10) target bundleno = 541 (0x21d), region = 44  ;;  %p271_p13 = scmp.lt.s32.totalorder (!%p237_p10), %s1636_s26, 1 }
  0x14   : > { %s1776_s16 = scalar_select %p172_p11, %s1632_s25, %s174_s14  }
  0x15   : > { %s1655_s15 = smov (!%p237_p10), 2   ;;  %s1656_s17 = smov (!%p237_p10), 18  }
  0x16   : > { %s1657_s18 = smov (!%p237_p10), 16   ;;  %s1664_s10 = smov (!%p237_p10), 110  }
  0x17   : > { %s1665_s13 = smov (!%p237_p10), 96  }
  0x18   : > { %v281_v0 = vld [vmem:[%s1973_s4] sm:$0x1]  ;;  %v287_v1 = vlaneseq  ;;  %v1654_v2 = vmov 0   ;;  %s270_s19 = scalar_select %p269_p12, %s1640_s27, 1  ;;  %v1542_v18 = vld [vmem:[%s1970_s1 + $0x10] sm:$0xff]   ;;  %vm331_vm6 = vcmask 130048  }
  0x19   : > { %vm283_vm0 = vcmp.eq.s32.totalorder %v281_v0, 15  ;;  %vm282_vm1 = vcmp.eq.s32.totalorder %v281_v0, 0  ;;  %1538 = vset.pattern.permute.xlu1 %v1654_v2  ;;  %1539 = vset.pattern.permute.xlu0 %v1654_v2  ;;  %s272_s20 = scalar_select %p271_p13, %s1636_s26, 1  ;;  %v1543_v21 = vld [vmem:[%s1970_s1] sm:$0xff]   ;;  %v1545_v23 = vld [vmem:[%s1970_s1 + $0x8] sm:$0xff]   ;;  %vm469_vm7 = vcmask 15360  }
  0x1a   : > { %v288_v3 = vshrl.u32 %v287_v1, 7  ;;  %v458_v4 = vsel %vm283_vm0, 1, %v1654_v2  ;;  %v286_v5 = vsel %vm282_vm1, 1, %v1654_v2  ;;  %s1285_s21 = sshll.u32 %s270_s19, 3  ;;  %s1658_s19 = smov 32   ;;  %1401 = vmatprep.mubr.msk.bf16.mxu0 %vm331_vm6, %v1542_v18  ;;  %1407 = vmatprep.mubr.msk.bf16.mxu1 %vm331_vm6, %v1543_v21  ;;  %v1548_v27 = vld [vmem:[%s1970_s1 + $0x30] sm:$0xff]  }
  0x1b   : > { %s1284_s22 = sshll.u32 %s272_s20, 2  ;;  %s1659_s20 = smov 34   ;;  %vm745_vm9 = vcmask 146432   ;;  %vm842_vm11 = vcmask 261120   ;;  %vm328_vm12 = vcmask 1039360   ;;  %v1544_v49 = vld [vmem:[%s1970_s1 + $0x18] sm:$0xff]  }
  0x1c   : > { %v289_v6 = vsub.s32 0, %v288_v3  ;;  %s275_s5 = sadd.s32 %s1285_s21, %s1284_s22  ;;  %s1660_s21 = smov 127   ;;  %v1546_v52 = vld [vmem:[%s1970_s1 + $0x20] sm:$0xff]   ;;  %vm1020_vm15 = vcmask 277504   ;;  %v1116_v3 = vld [vmem:[%s1971_s2 + $0x10] sm:$0xff]  ;;  %vm501_vm1 = vcmask 1031168  }
  0x1d   : > { %s1286_s7 = sshll.u32 %s275_s5, 2  ;;  %v1114_v1 = vld [vmem:[%s1971_s2] sm:$0xff]  ;;  %v1552_v18 = vld [vmem:[%s1970_s1 + $0x50] sm:$0xff]   ;;  %s267_s22 = sand.u32 1, %s1628_s24  }
  0x1e   : > { %v462_v7 = vrot.slane %v458_v4, %v289_v6  ;;  %v290_v8 = vrot.slane %v286_v5, %v289_v6  ;;  %s277_s14 = scalar_lea.vmem %s1969_s0, %s1286_s7  ;;  %s1663_s7 = smov 111   ;;  %v1146_v4 = vld [vmem:[%s1972_s3] sm:$0xff]  ;;  %v1117_v5 = vld [vmem:[%s1971_s2 + $0x18] sm:$0xff]  ;;  %v1148_v6 = vld [vmem:[%s1972_s3 + $0x10] sm:$0xff] }
  0x1f   : > { %v1794_v12 = vld [vmem:[%s277_s14] sm:$0xff]  ;;  %v1796_v13 = vld [vmem:[%s277_s14 + $0x8] sm:$0xff]  ;;  %s1368_s5 = sshll.u32 %s1640_s27, 1 }
  0x20   : > { %vm463_vm2 = vcmp.eq.s32.totalorder %v462_v7, 1  ;;  %vm291_vm3 = vcmp.eq.s32.totalorder %v290_v8, 1  ;;  %v1800_v14 = vcombine.low %v1794_v12, %v1796_v13  ;;  %v1804_v15 = vcombine.high %v1794_v12, %v1796_v13  ;;  %v284_v16 = vld [vmem:[%s277_s14] sm:$0xf]  ;;  %v285_v17 = vld [vmem:[%s277_s14 + $0x8] sm:$0xf] }
  0x21   : > { %vm464_vm4 = vmpackc.low %vm463_vm2, %vm463_vm2  ;;  %s1666_s14 = smov 95   ;;  %v1147_v7 = vld [vmem:[%s1972_s3 + $0x8] sm:$0xff]  ;;  %v1149_v8 = vld [vmem:[%s1972_s3 + $0x18] sm:$0xff]  ;;  %vm599_vm2 = vcmask 916480  }
  0x22   : > { %v465_v9 = vsel %vm464_vm4, 65537, %v1654_v2  ;;  %vm1785_vm5 = vmpackc.low %vm291_vm3, %vm291_vm3  ;;  %vm680_vm3 = vcmask 908288   ;;  %vm777_vm4 = vcmask 900096  }
  0x23   : > { %466 = vrot.lane.b32.xlu0 %v465_v9, %s1655_s15  ;;  %v563_v11 = vsel %vm1785_vm5, 65537, %v1654_v2  ;;  %742 = vrot.lane.b32.xlu1 %v465_v9, %s1656_s17  ;;  %v293_v19 = vsel %vm1785_vm5, 0, %v284_v16  ;;  %v294_v20 = vsel %vm1785_vm5, 0, %v285_v17  ;;  %s1667_s15 = smov 94   ;;  %v1115_v2 = vld [vmem:[%s1971_s2 + $0x8] sm:$0xff]  ;;  %v1549_v17 = vld [vmem:[%s1970_s1 + $0x38] sm:$0xff]  }
  0x24   : > { %v1299_v22 = vcombine.low %v293_v19, %v294_v20  ;;  %vm874_vm5 = vcmask 785408  }
  0x26   : > { %1405 = vmatprep.subr.bf16.mxu1 %v1299_v22 }
  0x27   : > { %564 = vrot.lane.b32.xlu0 %v563_v11, %s1657_s18  ;;  %839 = vrot.lane.b32.xlu1 %v563_v11, %s1658_s19  ;;  %s1661_s18 = smov 126   ;;  %s1662_s19 = smov 112  }
  0x28   : > { %1406 = vmatpush3.bf16.msra.mxu1 %v1299_v22  ;;  %v1551_v22 = vld [vmem:[%s1970_s1 + $0x48] sm:$0xff]  }
  0x2b   : > { %1017 = vrot.lane.b32.xlu0 %v465_v9, %s1659_s20  ;;  %324 = vrot.lane.b32.xlu1 %v1800_v14, %s1660_s21 }
  0x2c   : > { %1408 = vmatmul.mubr.msk.bf16.vlgmr.msra.gmra.mxu1 %vm331_vm6, %v1545_v23  ;;  %v1554_v23 = vld [vmem:[%s1970_s1 + $0x60] sm:$0xff]  }
  0x2d   : > { %1419 = vmatprep.mubr.msk.bf16.mxu1 %vm331_vm6, %v1548_v27  ;;  %v1553_v27 = vld [vmem:[%s1970_s1 + $0x58] sm:$0xff]  }
  0x2f   : > { %326 = vrot.lane.b32.xlu0 %v1804_v15, %s1660_s21  ;;  %s1183_s21 = sld [smem:[#allocation2]] }
  0x95   : > { %v467_v24 = vpop.permute.xlu0 %466  ;;  %v743_v25 = vpop.permute.xlu1 %742 }
  0x96   : > { %v468_v26 = vrot.slane %v467_v24, 4  ;;  %v744_v33 = vrot.slane %v743_v25, 4 }
  0x98   : > { %v470_v28 = vsel %vm469_vm7, %v468_v26, %v467_v24  ;;  %v746_v41 = vsel %vm745_vm9, %v744_v33, %v743_v25  ;;  %vm955_vm7 = vcmask 777216   ;;  %v1558_v33 = vld [vmem:[%s1970_s1 + $0x80] sm:$0xff]  }
  0x99   : > { %vm471_vm8 = vcmp.ne.s16.totalorder %v470_v28, 0  ;;  %v565_v29 = vpop.permute.xlu0 %564  ;;  %v840_v36 = vpop.permute.xlu1 %839  ;;  %vm747_vm13 = vcmp.ne.s16.totalorder %v746_v41, 0  ;;  %v1556_v28 = vld [vmem:[%s1970_s1 + $0x70] sm:$0xff]   ;;  %v1559_v41 = vld [vmem:[%s1970_s1 + $0x88] sm:$0xff]  }
  0x9a   : > { %v472_v30 = vsel %vm471_vm8, 0, %v1794_v12  ;;  %v473_v31 = vsel %vm471_vm8, 0, %v1796_v13  ;;  %v566_v32 = vrot.slane %v565_v29, 4  ;;  %v841_v42 = vrot.slane %v840_v36, 4 }
  0x9b   : > { %v1309_v34 = vcombine.high %v472_v30, %v473_v31  ;;  %v1308_v35 = vcombine.low %v472_v30, %v473_v31  ;;  %v748_v50 = vsel %vm747_vm13, 0, %v1794_v12  ;;  %v749_v51 = vsel %vm747_vm13, 0, %v1796_v13 }
  0x9c   : > { %v568_v37 = vsel %vm331_vm6, %v566_v32, %v565_v29  ;;  %v843_v47 = vsel %vm842_vm11, %v841_v42, %v840_v36  ;;  %v1337_v54 = vcombine.high %v748_v50, %v749_v51  ;;  %v1336_v55 = vcombine.low %v748_v50, %v749_v51  ;;  %v1555_v32 = vld [vmem:[%s1970_s1 + $0x68] sm:$0xff]  }
  0x9d   : > { %vm569_vm10 = vcmp.ne.s16.totalorder %v568_v37, 0  ;;  %499 = vrot.lane.b32.xlu0 %v1309_v34, %s1661_s18  ;;  %497 = vrot.lane.b32.xlu1 %v1308_v35, %s1661_s18  ;;  %v1018_v38 = vpop.permute.xlu0 %1017  ;;  %v325_v45 = vpop.permute.xlu1 %324  ;;  %vm844_vm14 = vcmp.ne.s16.totalorder %v843_v47, 0  ;;  %v1557_v37 = vld [vmem:[%s1970_s1 + $0x78] sm:$0xff]   ;;  %vm1052_vm8 = vcmask 769024  }
  0x9e   : > { %v570_v39 = vsel %vm569_vm10, 0, %v1794_v12  ;;  %v571_v40 = vsel %vm569_vm10, 0, %v1796_v13  ;;  %v1019_v53 = vrot.slane %v1018_v38, 4  ;;  %v845_v56 = vsel %vm844_vm14, 0, %v1794_v12 }
  0x9f   : > { %v1319_v43 = vcombine.high %v570_v39, %v571_v40  ;;  %v1318_v44 = vcombine.low %v570_v39, %v571_v40  ;;  %v846_v57 = vsel %vm844_vm14, 0, %v1796_v13 }
  0xa0   : > { %v1021_v58 = vsel %vm1020_vm15, %v1019_v53, %v1018_v38  ;;  %v1347_v59 = vcombine.high %v845_v56, %v846_v57  ;;  %v1346_v60 = vcombine.low %v845_v56, %v846_v57 }
  0xa1   : > { %597 = vrot.lane.b32.xlu0 %v1319_v43, %s1662_s19  ;;  %595 = vrot.lane.b32.xlu1 %v1318_v44, %s1662_s19  ;;  %v327_v46 = vpop.permute.xlu0 %326  ;;  %vm1022_vm0 = vcmp.ne.s16.totalorder %v1021_v58, 0  ;;  %s1188_s19 = scalar_lea.sflag [#allocation4], %s267_s22 }
  0xa2   : > { %v329_v48 = vsel %vm328_vm12, %v325_v45, %v327_v46  ;;  %v1023_v61 = vsel %vm1022_vm0, 0, %v1794_v12  ;;  %v1024_v62 = vsel %vm1022_vm0, 0, %v1796_v13  ;;  %v1547_v12 = vld [vmem:[%s1970_s1 + $0x28] sm:$0xff]   ;;  %v1550_v13 = vld [vmem:[%s1970_s1 + $0x40] sm:$0xff]  }
  0xa3   : > { %1399 = vmatprep.subr.bf16.mxu0 %v329_v48  ;;  %v1365_v63 = vcombine.high %v1023_v61, %v1024_v62  ;;  %v1364_v0 = vcombine.low %v1023_v61, %v1024_v62 }
  0xa4   : > { %1400 = vmatpush3.bf16.msra.mxu0 %v329_v48 }
  0xa5   : > { %678 = vrot.lane.b32.xlu0 %v1804_v15, %s1663_s7  ;;  %676 = vrot.lane.b32.xlu1 %v1800_v14, %s1663_s7  ;;  %s1198_s7 = sadd.s32 %s1636_s26, %s1368_s5  ;;  %s1668_s26 = smov [#allocation3]  }
  0xa6   : > { %s1564_s27 = sshll.u32 %s1668_s26, 4  ;;  %s1565_s27 = int_to_ptr.vmem [resolvable:$false] %s1564_s27 }
  0xa7   : > { %1402 = vmatmul.mubr.msk.bf16.vlgmr.msra.gmra.mxu0 %vm331_vm6, %v1544_v49 }
  0xa8   : > { %1413 = vmatprep.mubr.msk.bf16.mxu0 %vm331_vm6, %v1546_v52 }
  0xa9   : > { %775 = vrot.lane.b32.xlu0 %v1337_v54, %s1664_s10  ;;  %773 = vrot.lane.b32.xlu1 %v1336_v55, %s1664_s10  ;;  %s1369_s10 = sshll.u32 %s1198_s7, 4 }
  0xaa   : > { %s1200_s18 = scalar_lea.hbm %s1975_s6, %s1369_s10 }
  0xad   : > { %872 = vrot.lane.b32.xlu0 %v1347_v59, %s1665_s13  ;;  %870 = vrot.lane.b32.xlu1 %v1346_v60, %s1665_s13  ;;  %s268_s13 = scalar_lea.vmem [#allocation3], %s267_s22 }
  0xb1   : > { %953 = vrot.lane.b32.xlu0 %v1804_v15, %s1666_s14  ;;  %951 = vrot.lane.b32.xlu1 %v1800_v14, %s1666_s14  ;;  %s1202_s14 = sshll.u32 %s268_s13, 4  ;;  %s1203_s14 = int_to_ptr.vmem [resolvable:$true] %s1202_s14 }
  0xb2   : > { %s1560_s20 = scalar_lea.vmem %s1203_s14, 16  ;;  %p1567_p4 = scmp.lt.s32.totalorder %s1203_s14, %s1565_s27 }
  0xb3   : > { %p1561_p0 = scmp.ne.s32.totalorder %s1203_s14, %s1560_s20 }
  0xb5   : > { %1050 = vrot.lane.b32.xlu0 %v1365_v63, %s1667_s15  ;;  %1048 = vrot.lane.b32.xlu1 %v1364_v0, %s1667_s15  ;;  %p1562_p1 = pnand %p1561_p0, %p1758_p3 }
  0xb7   : > { %p1563_p2 = pneg %p1562_p1 }
  0xb9   : > { %1120 = vperm.xlu1 %1538, %v1114_v1   ;;  %1125 = vperm.xlu0 %1539, %v1115_v2  }
  0xbd   : > { %1130 = vperm.xlu1 %1538, %v1116_v3   ;;  %1152 = vperm.xlu0 %1539, %v1146_v4  }
  0xc1   : > { %1135 = vperm.xlu1 %1538, %v1117_v5   ;;  %1162 = vperm.xlu0 %1539, %v1148_v6  }
  0xc5   : > { %1157 = vperm.xlu1 %1538, %v1147_v7  }
  0xc9   : > { %1167 = vperm.xlu1 %1538, %v1149_v8  }
  0xec   : > { %v1409_v43 = vpop.f32.mrf.mxu1 }
  0xee   : > { %v443_v45 = vpop.f32.mrf.mxu1 }
  0xf0   : > { %v1410_v47 = vpop.f32.mrf.mxu1 }
  0xf2   : > { %v446_v50 = vpop.f32.mrf.mxu1 }
 0x10f   : > { %v500_v9 = vpop.permute.xlu0 %499  ;;  %v498_v10 = vpop.permute.xlu1 %497 }
 0x110   : > { %v502_v11 = vsel %vm501_vm1, %v498_v10, %v500_v9 }
 0x111   : > { %1411 = vmatprep.subr.bf16.mxu0 %v502_v11 }
 0x112   : > { %1412 = vmatpush3.bf16.msra.mxu0 %v502_v11 }
 0x113   : > { %v598_v14 = vpop.permute.xlu0 %597  ;;  %v596_v15 = vpop.permute.xlu1 %595 }
 0x114   : > { %v600_v16 = vsel %vm599_vm2, %v596_v15, %v598_v14 }
 0x115   : > { %1414 = vmatmul.mubr.msk.bf16.vlgmr.msra.gmra.mxu0 %vm331_vm6, %v1547_v12  ;;  %1417 = vmatprep.subr.bf16.mxu1 %v600_v16 }
 0x116   : > { %1418 = vmatpush3.bf16.msra.mxu1 %v600_v16  ;;  %1425 = vmatprep.mubr.msk.bf16.mxu0 %vm331_vm6, %v1550_v13 }
 0x117   : > { %v679_v19 = vpop.permute.xlu0 %678  ;;  %v677_v20 = vpop.permute.xlu1 %676 }
 0x118   : > { %v681_v21 = vsel %vm680_vm3, %v677_v20, %v679_v19 }
 0x119   : > { %1420 = vmatmul.mubr.msk.bf16.vlgmr.msra.gmra.mxu1 %vm331_vm6, %v1549_v17  ;;  %1423 = vmatprep.subr.bf16.mxu0 %v681_v21 }
 0x11a   : > { %1424 = vmatpush3.bf16.msra.mxu0 %v681_v21  ;;  %1431 = vmatprep.mubr.msk.bf16.mxu1 %vm331_vm6, %v1552_v18 }
 0x11b   : > { %v776_v24 = vpop.permute.xlu0 %775  ;;  %v774_v25 = vpop.permute.xlu1 %773 }
 0x11c   : > { %v778_v26 = vsel %vm777_vm4, %v774_v25, %v776_v24 }
 0x11d   : > { %1426 = vmatmul.mubr.msk.bf16.vlgmr.msra.gmra.mxu0 %vm331_vm6, %v1551_v22  ;;  %1429 = vmatprep.subr.bf16.mxu1 %v778_v26 }
 0x11e   : > { %1430 = vmatpush3.bf16.msra.mxu1 %v778_v26  ;;  %1437 = vmatprep.mubr.msk.bf16.mxu0 %vm331_vm6, %v1554_v23 }
 0x11f   : > { %v873_v29 = vpop.permute.xlu0 %872  ;;  %v871_v30 = vpop.permute.xlu1 %870 }
 0x120   : > { %v875_v31 = vsel %vm874_vm5, %v871_v30, %v873_v29 }
 0x121   : > { %1432 = vmatmul.mubr.msk.bf16.vlgmr.msra.gmra.mxu1 %vm331_vm6, %v1553_v27  ;;  %1435 = vmatprep.subr.bf16.mxu0 %v875_v31 }
 0x122   : > { %1436 = vmatpush3.bf16.msra.mxu0 %v875_v31  ;;  %1443 = vmatprep.mubr.msk.bf16.mxu1 %vm331_vm6, %v1556_v28 }
 0x123   : > { %v954_v34 = vpop.permute.xlu0 %953  ;;  %v952_v35 = vpop.permute.xlu1 %951 }
 0x124   : > { %v956_v36 = vsel %vm955_vm7, %v952_v35, %v954_v34 }
 0x125   : > { %1438 = vmatmul.mubr.msk.bf16.vlgmr.msra.gmra.mxu0 %vm331_vm6, %v1555_v32  ;;  %1441 = vmatprep.subr.bf16.mxu1 %v956_v36 }
 0x126   : > { %1442 = vmatpush3.bf16.msra.mxu1 %v956_v36  ;;  %1449 = vmatprep.mubr.msk.bf16.mxu0 %vm331_vm6, %v1558_v33 }
 0x127   : > { %v1051_v38 = vpop.permute.xlu0 %1050  ;;  %v1049_v39 = vpop.permute.xlu1 %1048 }
 0x128   : > { %v1053_v40 = vsel %vm1052_vm8, %v1049_v39, %v1051_v38 }
 0x129   : > { %1444 = vmatmul.mubr.msk.bf16.vlgmr.msra.gmra.mxu1 %vm331_vm6, %v1557_v37  ;;  %1447 = vmatprep.subr.bf16.mxu0 %v1053_v40 }
 0x12a   : > { %1448 = vmatpush3.bf16.msra.mxu0 %v1053_v40 }
 0x12d   : > { %1450 = vmatmul.mubr.msk.bf16.vlgmr.msra.gmra.mxu0 %vm331_vm6, %v1559_v41 }
 0x134   : > { %v1121_v5 = vpop.permute.xlu1 %1120  ;;  %v1126_v31 = vpop.permute.xlu0 %1125 }
 0x138   : > { %v1131_v24 = vpop.permute.xlu1 %1130 }
 0x167   : > { %v1403_v42 = vpop.f32.mrf.mxu0 }
 0x168   : > { %v452_v62 = vadd.f32 %v1409_v43, %v1403_v42 }
 0x169   : > { %v372_v44 = vpop.f32.mrf.mxu0 }
 0x16a   : > { %v444_v63 = vadd.f32 %v443_v45, %v372_v44  ;;  %v1136_v44 = vpop.permute.xlu1 %1135 }
 0x16b   : > { %v1404_v46 = vpop.f32.mrf.mxu0 }
 0x16c   : > { %v455_v2 = vadd.f32 %v1410_v47, %v1404_v46 }
 0x16d   : > { %v375_v48 = vpop.f32.mrf.mxu0 }
 0x16e   : > { %v447_v8 = vadd.f32 %v446_v50, %v375_v48 }
 0x1d5   : > { %v1415_v49 = vpop.f32.mrf.mxu0 }
 0x1d6   : > { %v561_v3 = vadd.f32 %v1415_v49, %v452_v62  ;;  %v1153_v49 = vpop.permute.xlu0 %1152 }
 0x1d7   : > { %v544_v51 = vpop.f32.mrf.mxu0 }
 0x1d8   : > { %v559_v4 = vadd.f32 %v544_v51, %v444_v63 }
 0x1d9   : > { %v1416_v52 = vpop.f32.mrf.mxu0  ;;  %v1421_v53 = vpop.f32.mrf.mxu1 }
 0x1da   : > { %v562_v9 = vadd.f32 %v1416_v52, %v455_v2  ;;  %v659_v10 = vadd.f32 %v1421_v53, %v561_v3 }
 0x1db   : > { %v547_v54 = vpop.f32.mrf.mxu0  ;;  %v642_v55 = vpop.f32.mrf.mxu1 }
 0x1dc   : > { %v657_v11 = vadd.f32 %v642_v55, %v559_v4  ;;  %v560_v14 = vadd.f32 %v547_v54, %v447_v8 }
 0x1dd   : > { %v1422_v56 = vpop.f32.mrf.mxu1  ;;  %v1427_v57 = vpop.f32.mrf.mxu0 }
 0x1de   : > { %v660_v15 = vadd.f32 %v1422_v56, %v562_v9  ;;  %v740_v16 = vadd.f32 %v1427_v57, %v659_v10  ;;  %v1158_v56 = vpop.permute.xlu1 %1157  ;;  %v1184_v10 = vstv %s1183_s21  ;;  %s1566_s21 = scalar_lea.vmem %s1565_s27, 32 }
 0x1df   : > { %v645_v58 = vpop.f32.mrf.mxu1  ;;  %v723_v59 = vpop.f32.mrf.mxu0  ;;  %p1568_p5 = scmp.lt.s32.totalorder %s1566_s21, %s1560_s20 }
 0x1e0   : > { %v738_v17 = vadd.f32 %v723_v59, %v657_v11  ;;  %v658_v20 = vadd.f32 %v645_v58, %v560_v14  ;;  %v1163_v59 = vpop.permute.xlu0 %1162 }
 0x1e1   : > { %v1428_v60 = vpop.f32.mrf.mxu0  ;;  %v1433_v61 = vpop.f32.mrf.mxu1  ;;  %p1569_p6 = por %p1568_p5, %p1567_p4 }
 0x1e2   : > { %v741_v21 = vadd.f32 %v1428_v60, %v660_v15  ;;  %v837_v22 = vadd.f32 %v1433_v61, %v740_v16 }
 0x1e3   : > { %v726_v0 = vpop.f32.mrf.mxu0  ;;  %v820_v1 = vpop.f32.mrf.mxu1  ;;  %p1570_p7 = pnand %p1569_p6, %p1563_p2 }
 0x1e4   : > { %v835_v23 = vadd.f32 %v820_v1, %v738_v17  ;;  %v739_v27 = vadd.f32 %v726_v0, %v658_v20  ;;  %v1168_v1 = vpop.permute.xlu1 %1167 }
 0x1e5   : > { %v1434_v6 = vpop.f32.mrf.mxu1  ;;  %v1439_v7 = vpop.f32.mrf.mxu0 }
 0x1e6   : > { %v838_v28 = vadd.f32 %v1434_v6, %v741_v21  ;;  %v934_v29 = vadd.f32 %v1439_v7, %v837_v22 }
 0x1e7   : > { %v823_v12 = vpop.f32.mrf.mxu1  ;;  %v917_v13 = vpop.f32.mrf.mxu0 }
 0x1e8   : > { %v932_v30 = vadd.f32 %v917_v13, %v835_v23  ;;  %v836_v34 = vadd.f32 %v823_v12, %v739_v27 }
 0x1e9   : > { %v1440_v18 = vpop.f32.mrf.mxu0  ;;  %v1445_v19 = vpop.f32.mrf.mxu1 }
 0x1ea   : > { %v935_v35 = vadd.f32 %v1440_v18, %v838_v28  ;;  %v1015_v36 = vadd.f32 %v1445_v19, %v934_v29 }
 0x1eb   : > { %v920_v25 = vpop.f32.mrf.mxu0  ;;  %v998_v26 = vpop.f32.mrf.mxu1 }
 0x1ec   : > { %v1013_v37 = vadd.f32 %v998_v26, %v932_v30  ;;  %v933_v40 = vadd.f32 %v920_v25, %v836_v34 }
 0x1ed   : > { %v1446_v32 = vpop.f32.mrf.mxu1  ;;  %v1451_v33 = vpop.f32.mrf.mxu0 }
 0x1ee   : > { %v1016_v41 = vadd.f32 %v1446_v32, %v935_v35  ;;  %v1112_v42 = vadd.f32 %v1451_v33, %v1015_v36 }
 0x1ef   : > { %v1001_v38 = vpop.f32.mrf.mxu1  ;;  %v1095_v39 = vpop.f32.mrf.mxu0 }
 0x1f0   : > { %v1110_v43 = vadd.f32 %v1095_v39, %v1013_v37  ;;  %v1014_v46 = vadd.f32 %v1001_v38, %v933_v40  ;;  %v1140_v51 = vadd.f32 %v1131_v24, %v1112_v42 }
 0x1f1   : > { %v1452_v45 = vpop.f32.mrf.mxu0 }
 0x1f2   : > { %v1138_v47 = vadd.f32 %v1121_v5, %v1110_v43  ;;  %v1113_v48 = vadd.f32 %v1452_v45, %v1016_v41  ;;  %v1144_v57 = vmax.f32 %v1140_v51, 0.0 }
 0x1f3   : > { %v1098_v50 = vpop.f32.mrf.mxu0 }
 0x1f4   : > { %v1111_v52 = vadd.f32 %v1098_v50, %v1014_v46  ;;  %v1142_v53 = vmax.f32 %v1138_v47, 0.0  ;;  %v1141_v54 = vadd.f32 %v1136_v44, %v1113_v48  ;;  %v1172_v63 = vmul.f32 %v1163_v59, %v1144_v57 }
 0x1f6   : > { %v1139_v55 = vadd.f32 %v1126_v31, %v1111_v52  ;;  %v1170_v60 = vmul.f32 %v1153_v49, %v1142_v53  ;;  %v1145_v61 = vmax.f32 %v1141_v54, 0.0 }
 0x1f8   : > { %v1143_v58 = vmax.f32 %v1139_v55, 0.0  ;;  %v1173_v2 = vmul.f32 %v1168_v1, %v1145_v61 }
 0x1fa   : > { %v1171_v62 = vmul.f32 %v1158_v56, %v1143_v58 }
 0x1fc   : > { %v1174_v0 = vadd.f32 %v1171_v62, %v1170_v60 }
 0x1fe   : > { %v1175_v3 = vadd.f32 %v1174_v0, %v1172_v63 }
 0x200   : > { %v1176_v4 = vadd.f32 %v1175_v3, %v1173_v2 }
 0x202   : > { %v1177_v5 = vrot.slane %v1176_v4, 4 }
 0x204   : > { %v1178_v6 = vadd.f32 %v1177_v5, %v1176_v4 }
 0x206   : > { %v1179_v7 = vrot.slane %v1178_v6, 2 }
 0x208   : > { %v1180_v8 = vadd.f32 %v1179_v7, %v1178_v6 }
 0x20a   : > { %v1181_v9 = vrot.slane %v1180_v8, 1 }
 0x20c   : > { %v1182_v11 = vadd.f32 %v1181_v9, %v1180_v8 }
 0x20e   : > { %v1185_v12 = vadd.f32 %v1184_v10, %v1182_v11 }
 0x210   : > { %1186 = vst [vmem:[%s268_s13] sm:$0x1] %v1185_v12 }
 0x211   : > { %1573 = shalt.err (!%p1570_p7)
}
 0x212   : > { %s1574_s5 = scalar_lea.hbm %s1200_s18, 16  ;;  %s1578_s10 = scalar_lea.hbm %s1975_s6, 64 }
 0x213   : > { %p1575_p9 = scmp.ne.s32.totalorder %s1200_s18, %s1574_s5  ;;  %p1579_p12 = scmp.lt.s32.totalorder %s1200_s18, %s1975_s6 }
 0x214   : > { %p1580_p13 = scmp.lt.s32.totalorder %s1578_s10, %s1574_s5 }
 0x215   : > { %p1576_p10 = pnand %p1575_p9, %p1758_p3 }
 0x216   : > { %p1581_p0 = por %p1580_p13, %p1579_p12 }
 0x217   : > { %p1577_p11 = pneg %p1576_p10 }
 0x219   : > { %p1582_p1 = pnand %p1581_p0, %p1577_p11 }
 0x21b   : > { %1585 = shalt.err (!%p1582_p1)
}
 0x21c   : > { %1453 = dma.vmem_to_hbm [thread:$0]  (%p1758_p3), %s1203_s14, 16, %s1200_s18, %s1188_s19  }
 0x21d PF: > { %p1459_p2 = scmp.ge.s32.totalorder %s1652_s30, 2  ;;  %s1214_s17 = sand.u32 1, %s1624_s23  }
 0x21e   : > { %s1215_s20 = scalar_lea.sflag [#allocation4], %s1214_s17 }
 0x21f   : > { %p1456_p4 = pnand %p1459_p2, %p1767_p8 }
 0x221   : > { %p1457_p5 = pneg %p1456_p4 }
 0x223   : > { %1619 = dma.done.wait (%p1457_p5), %s1215_s20, 16  }
 0x224   : > { %1621 = vsyncadd (%p1457_p5), %s1215_s20, 4294967280  ;;  %s20_s30 = sadd.s32 1, %s1652_s30   ;;  %s1980_s23 = smov %s1628_s24 }
 0x225   : > { %p17_p6 = scmp.ge.s32.totalorder %s20_s30, 6   ;;  %s1981_s24 = smov %s1632_s25 }
 0x226   : > { %s1982_s25 = smov %s1776_s16  ;;  %s1983_s26 = smov %s1644_s28 }
 0x227   : > { %s1984_s27 = smov %s1648_s29  ;;  %s1985_s28 = smov %s1988_s8 }
 0x228   : > { %s1986_s29 = smov %s1992_s9  ;;  %19 = sbr.rel (!%p17_p6) target bundleno = 7 (0x7), region = 87 }
 0x22d   :  { %1219 = vsyncpa [#allocation4], 1 }
 0x22e   :  { %1221 = vsyncpa [#allocation4 + $0x1], 1 }

</bundles_post_ra>
